<compile_context>
chip_gen: v6e
topology: v6e:2x2x1
jax: 0.10.0
libtpu: 0.0.40
codegen_flags: <defaults>
</compile_context>

<pallas_src>
import functools

import jax
import jax.numpy as jnp
from jax import lax
from jax.experimental import pallas as pl
from jax.experimental.pallas import tpu as pltpu


# ----------------------------------------------------------------------------
# Pallas kernel: one full MBConv block for ONE batch element per grid step.
# Everything is 2-D (channels on sublanes, flattened spatial on lanes).
# ----------------------------------------------------------------------------
def mbconv_kernel(x_ref,        # (1, Cin, HW)
                  pA_ref,       # (Cmid, NA)  packed: w_exp^T | w_dw | w_se1^T | w_se2 | scale/bias cols | b_se1(row0)
                  pB_ref,       # (Cout, NB)  packed: w_proj^T | proj_s | proj_b
                  mask_ref,     # (K*K, HW)   per-tap validity masks (TF 'same' padding)
                  o_ref,        # (1, Cout, HW)
                  *, Cin, Cmid, Cout, Csq, KK, HW, shifts,
                  oA_dw, oA_se1, oA_se2, oA_vec, oA_bse1, skip):
    x = x_ref[0].astype(jnp.float32)                    # (Cin, HW)   lane-dense load
    A = pA_ref[...]                                     # (Cmid, NA)
    B = pB_ref[...]                                     # (Cout, NB)
    mask = mask_ref[...]                                # (KK, HW)

    # --- expand 1x1 conv (MXU) + folded BN + Swish -----------------------------
    e = jnp.dot(A[:, :Cin], x, preferred_element_type=jnp.float32)   # (Cmid, HW)
    e = e * A[:, oA_vec:oA_vec + 1] + A[:, oA_vec + 1:oA_vec + 2]
    e = e * jax.nn.sigmoid(e)

    # --- depthwise KxK conv (stride 1, TF 'same'): shifted-FMA taps via rolls ---
    acc = jnp.zeros((Cmid, HW), jnp.float32)
    for t in range(KK):
        w_t = A[:, oA_dw + t:oA_dw + t + 1] * mask[t:t + 1, :]        # (Cmid, HW)
        src = e if shifts[t] == 0 else pltpu.roll(e, shifts[t], axis=1)
        acc = acc + src * w_t
    d = acc * A[:, oA_vec + 2:oA_vec + 3] + A[:, oA_vec + 3:oA_vec + 4]
    d = d * jax.nn.sigmoid(d)

    # --- SE: global avg-pool (lane reduce) -> FC -> Swish -> FC -> sigmoid gate --
    pooled = jnp.mean(d, axis=1, keepdims=True)                       # (Cmid, 1)
    s1 = (jnp.sum(A[:, oA_se1:oA_se1 + Csq] * pooled, axis=0, keepdims=True)
          + A[0:1, oA_bse1:oA_bse1 + Csq])                            # (1, Csq)
    s1 = s1 * jax.nn.sigmoid(s1)
    s2 = (jnp.sum(A[:, oA_se2:oA_se2 + Csq] * s1, axis=1, keepdims=True)
          + A[:, oA_vec + 4:oA_vec + 5])                              # (Cmid, 1)
    d = d * jax.nn.sigmoid(s2)                                        # per-channel gate

    # --- project 1x1 conv (MXU) + folded BN (no activation) --------------------
    out = jnp.dot(B[:, :Cmid], d, preferred_element_type=jnp.float32)  # (Cout, HW)
    out = out * B[:, Cmid:Cmid + 1] + B[:, Cmid + 1:Cmid + 2]

    # --- skip connection --------------------------------------------------------
    if skip:                                   # wrapper guarantees Cin==Cout, stride==1
        out = out + x

    o_ref[0] = out.astype(o_ref.dtype)         # (Cout, HW): full-vreg, lane-dense store


# ----------------------------------------------------------------------------
# Wrapper (glue): reshape NCHW <-> (N, C, H*W), parameter packing, pallas_call.
# ----------------------------------------------------------------------------
def mbconv_pallas(x_nchw, p, *, K, stride, skip):
    N, Cin, H, W = x_nchw.shape
    if "w_exp" not in p:
        # TODO(synk): expand == 1 (Identity expand branch) not implemented.
        raise NotImplementedError("expand == 1 is not supported by this Pallas kernel")
    if stride != 1:
        # TODO(synk): stride > 1 needs lane-subsampled output; not implemented.
        raise NotImplementedError("stride > 1 is not supported by this Pallas kernel")
    Cmid = p["w_exp"].shape[0]
    Cout = p["w_proj"].shape[0]
    Csq = p["w_se1"].shape[0]
    skip = bool(skip) and stride == 1 and Cin == Cout   # same rule as the PyTorch module

    HW = H * W
    KK = K * K
    Hout, Wout = H, W                                   # stride == 1
    pad_h = max(0, (Hout - 1) * stride + K - H)
    pad_w = max(0, (Wout - 1) * stride + K - W)
    pad_t, pad_l = pad_h // 2, pad_w // 2

    # ---- pack all small parameters into two sublane-aligned arrays -------------
    oA_exp = 0
    oA_dw = oA_exp + Cin
    oA_se1 = oA_dw + KK
    oA_se2 = oA_se1 + Csq
    oA_vec = oA_se2 + Csq          # exp_s, exp_b, dw_s, dw_b, b_se2  (5 columns)
    oA_bse1 = oA_vec + 5           # b_se1 stored in row 0
    NA = oA_bse1 + Csq
    packA = jnp.zeros((Cmid, NA), jnp.float32)
    packA = packA.at[:, oA_exp:oA_exp + Cin].set(p["w_exp"])              # (Cmid, Cin)
    packA = packA.at[:, oA_dw:oA_dw + KK].set(p["w_dw"].reshape(Cmid, KK))
    packA = packA.at[:, oA_se1:oA_se1 + Csq].set(p["w_se1"].T)            # (Cmid, Csq)
    packA = packA.at[:, oA_se2:oA_se2 + Csq].set(p["w_se2"])              # (Cmid, Csq)
    packA = packA.at[:, oA_vec + 0].set(p["exp_s"])
    packA = packA.at[:, oA_vec + 1].set(p["exp_b"])
    packA = packA.at[:, oA_vec + 2].set(p["dw_s"])
    packA = packA.at[:, oA_vec + 3].set(p["dw_b"])
    packA = packA.at[:, oA_vec + 4].set(p["b_se2"])
    packA = packA.at[0, oA_bse1:oA_bse1 + Csq].set(p["b_se1"])

    NB = Cmid + 2
    packB = jnp.zeros((Cout, NB), jnp.float32)
    packB = packB.at[:, :Cmid].set(p["w_proj"])                           # (Cout, Cmid)
    packB = packB.at[:, Cmid].set(p["proj_s"])
    packB = packB.at[:, Cmid + 1].set(p["proj_b"])

    # ---- per-tap edge masks and lane shifts for the rolled depthwise conv ------
    hh = jnp.arange(H).reshape(H, 1)
    ww = jnp.arange(W).reshape(1, W)
    mask_rows, shifts = [], []
    for dy in range(K):
        for dx in range(K):
            oy, ox = dy - pad_t, dx - pad_l
            valid = ((hh + oy >= 0) & (hh + oy < H) &
                     (ww + ox >= 0) & (ww + ox < W))
            mask_rows.append(valid.reshape(HW))
            shifts.append(int((-(oy * W + ox)) % HW))
    mask = jnp.stack(mask_rows).astype(jnp.float32)                        # (KK, HW)

    x2d = x_nchw.reshape(N, Cin, HW)            # NCHW -> (N, C, H*W): pure reshape

    kernel = functools.partial(
        mbconv_kernel, Cin=Cin, Cmid=Cmid, Cout=Cout, Csq=Csq, KK=KK, HW=HW,
        shifts=tuple(shifts), oA_dw=oA_dw, oA_se1=oA_se1, oA_se2=oA_se2,
        oA_vec=oA_vec, oA_bse1=oA_bse1, skip=skip)

    out2d = pl.pallas_call(
        kernel,
        out_shape=jax.ShapeDtypeStruct((N, Cout, HW), x_nchw.dtype),
        grid=(N,),
        in_specs=[
            pl.BlockSpec((1, Cin, HW), lambda n: (n, 0, 0)),
            pl.BlockSpec((Cmid, NA), lambda n: (0, 0)),
            pl.BlockSpec((Cout, NB), lambda n: (0, 0)),
            pl.BlockSpec((KK, HW), lambda n: (0, 0)),
        ],
        out_specs=pl.BlockSpec((1, Cout, HW), lambda n: (n, 0, 0)),
        compiler_params=pltpu.CompilerParams(
            dimension_semantics=("parallel",)),      # v7x: batch across both TCs
    )(x2d, packA, packB, mask)
    return out2d.reshape(N, Cout, Hout, Wout)        # back to NCHW (pure reshape)


# ----------------------------------------------------------------------------
# Pure-JAX reference (lax.conv / einsum) for correctness checking.
# ----------------------------------------------------------------------------
def mbconv_ref(x_nchw, p, *, K, stride, skip):
    N, Cin, H, W = x_nchw.shape
    Cmid = p["w_exp"].shape[0]
    Cout = p["w_proj"].shape[0]
    skip = bool(skip) and stride == 1 and Cin == Cout
    x = jnp.transpose(x_nchw, (0, 2, 3, 1))                      # NHWC
    e = jnp.einsum("nhwc,mc->nhwm", x, p["w_exp"])
    e = e * p["exp_s"] + p["exp_b"]
    e = e * jax.nn.sigmoid(e)
    Hout = (H + stride - 1) // stride
    Wout = (W + stride - 1) // stride
    pad_h = max(0, (Hout - 1) * stride + K - H)
    pad_w = max(0, (Wout - 1) * stride + K - W)
    w_hwio = jnp.transpose(p["w_dw"], (1, 2, 0))[:, :, None, :]  # (K, K, 1, Cmid)
    d = lax.conv_general_dilated(
        e, w_hwio, window_strides=(stride, stride),
        padding=((pad_h // 2, pad_h - pad_h // 2),
                 (pad_w // 2, pad_w - pad_w // 2)),
        dimension_numbers=("NHWC", "HWIO", "NHWC"),
        feature_group_count=Cmid)
    d = d * p["dw_s"] + p["dw_b"]
    d = d * jax.nn.sigmoid(d)
    pooled = jnp.mean(d, axis=(1, 2), keepdims=True)
    s1 = jnp.einsum("nhwc,qc->nhwq", pooled, p["w_se1"]) + p["b_se1"]
    s1 = s1 * jax.nn.sigmoid(s1)
    s2 = jnp.einsum("nhwq,cq->nhwc", s1, p["w_se2"]) + p["b_se2"]
    d = d * jax.nn.sigmoid(s2)
    pr = jnp.einsum("nhwc,oc->nhwo", d, p["w_proj"])
    pr = pr * p["proj_s"] + p["proj_b"]
    if skip:
        pr = pr + x
    return jnp.transpose(pr, (0, 3, 1, 2))


# ----------------------------------------------------------------------------
# Deterministic parameter construction (PyTorch-like layouts, BN folded).
# ----------------------------------------------------------------------------
def fold_bn(key, C, eps=1e-3):
    k1, k2, k3, k4 = jax.random.split(key, 4)
    gamma = 1.0 + 0.1 * jax.random.normal(k1, (C,), jnp.float32)
    beta = 0.05 * jax.random.normal(k2, (C,), jnp.float32)
    mean = 0.05 * jax.random.normal(k3, (C,), jnp.float32)
    var = 1.0 + 0.1 * jnp.abs(jax.random.normal(k4, (C,), jnp.float32))
    scale = gamma / jnp.sqrt(var + eps)
    bias = beta - mean * scale
    return scale, bias


def make_params(key, Cin, Cout, Cmid, Csq, K):
    keys = jax.random.split(key, 10)
    p = {}
    p["w_exp"] = 0.2 * jax.random.normal(keys[0], (Cmid, Cin), jnp.float32)
    p["exp_s"], p["exp_b"] = fold_bn(keys[1], Cmid)
    p["w_dw"] = 0.2 * jax.random.normal(keys[2], (Cmid, K, K), jnp.float32)
    p["dw_s"], p["dw_b"] = fold_bn(keys[3], Cmid)
    p["w_se1"] = 0.2 * jax.random.normal(keys[4], (Csq, Cmid), jnp.float32)
    p["b_se1"] = 0.05 * jax.random.normal(keys[5], (Csq,), jnp.float32)
    p["w_se2"] = 0.2 * jax.random.normal(keys[6], (Cmid, Csq), jnp.float32)
    p["b_se2"] = 0.05 * jax.random.normal(keys[7], (Cmid,), jnp.float32)
    p["w_proj"] = 0.2 * jax.random.normal(keys[8], (Cout, Cmid), jnp.float32)
    p["proj_s"], p["proj_b"] = fold_bn(keys[9], Cout)
    return p


if __name__ == "__main__":
    # MBConv(in_=8, out_=8, expand=2, kernel_size=3, stride=1, skip=True, se_ratio=0.25)
    N, Cin, H, W = 2, 8, 16, 16
    expand, K, stride, se_ratio = 2, 3, 1, 0.25
    Cout = Cin
    Cmid = Cin * expand
    Csq = int(Cin * se_ratio)
    skip = True

    key = jax.random.PRNGKey(0)
    kx, kp = jax.random.split(key)
    x = jax.random.normal(kx, (N, Cin, H, W), jnp.float32)   # NCHW, like PyTorch
    params = make_params(kp, Cin, Cout, Cmid, Csq, K)

    out = mbconv_pallas(x, params, K=K, stride=stride, skip=skip)
    out = jax.block_until_ready(out)

    ref = mbconv_ref(x, params, K=K, stride=stride, skip=skip)
    assert out.shape == (N, Cout, H, W)
    max_err = float(jnp.max(jnp.abs(out - ref)))
    assert jnp.allclose(out, ref, rtol=3e-4, atol=1e-4), max_err

    print("KERNEL_OK")
</pallas_src>

<mosaic_0001>
module attributes {stable_mosaic.version = 11 : i64} {
  func.func @mbconv_kernel(%arg0: i32, %arg1: memref<1x8x256xf32, #tpu.memory_space<vmem>>, %arg2: memref<16x28xf32, #tpu.memory_space<vmem>>, %arg3: memref<8x18xf32, #tpu.memory_space<vmem>>, %arg4: memref<9x256xf32, #tpu.memory_space<vmem>>, %arg5: memref<1x8x256xf32, #tpu.memory_space<vmem>>) attributes {dimension_semantics = [#tpu.dimension_semantics<parallel>], iteration_bounds = array<i64: 2>, scalar_prefetch = 0 : i64, scratch_operands = 0 : i64, tpu.core_type = #tpu.core_type<tc>, window_params = [{transform_indices = @transform_0, window_bounds = array<i64: 1, 8, 256>}, {pipeline_mode = #tpu.pipeline_mode<synchronous>, transform_indices = @transform_1, window_bounds = array<i64: 16, 28>}, {pipeline_mode = #tpu.pipeline_mode<synchronous>, transform_indices = @transform_2, window_bounds = array<i64: 8, 18>}, {pipeline_mode = #tpu.pipeline_mode<synchronous>, transform_indices = @transform_3, window_bounds = array<i64: 9, 256>}, {transform_indices = @transform_4, window_bounds = array<i64: 1, 8, 256>}]} {
    %c0 = arith.constant 0 : index
    %c0_0 = arith.constant 0 : index
    %c0_1 = arith.constant 0 : index
    %0 = vector.load %arg1[%c0, %c0_0, %c0_1] : memref<1x8x256xf32, #tpu.memory_space<vmem>>, vector<1x8x256xf32>
    %1 = vector.shape_cast %0 : vector<1x8x256xf32> to vector<8x256xf32>
    %c0_2 = arith.constant 0 : index
    %c0_3 = arith.constant 0 : index
    %2 = vector.load %arg2[%c0_2, %c0_3] : memref<16x28xf32, #tpu.memory_space<vmem>>, vector<16x28xf32>
    %c0_4 = arith.constant 0 : index
    %c0_5 = arith.constant 0 : index
    %3 = vector.load %arg3[%c0_4, %c0_5] : memref<8x18xf32, #tpu.memory_space<vmem>>, vector<8x18xf32>
    %c0_6 = arith.constant 0 : index
    %c0_7 = arith.constant 0 : index
    %4 = vector.load %arg4[%c0_6, %c0_7] : memref<9x256xf32, #tpu.memory_space<vmem>>, vector<9x256xf32>
    %5 = vector.extract_strided_slice %2 {offsets = [0, 0], sizes = [16, 8], strides = [1, 1]} : vector<16x28xf32> to vector<16x8xf32>
    %cst = arith.constant dense<0.000000e+00> : vector<16x256xf32>
    %6 = tpu.matmul %5, %1, %cst {dimension_numbers = #tpu.dot_dimension_numbers<[1], [0], [0], [1], [0, 0, 1, 1], [], []>} : vector<16x8xf32>, vector<8x256xf32>, vector<16x256xf32> -> vector<16x256xf32>
    %7 = vector.extract_strided_slice %2 {offsets = [0, 21], sizes = [16, 1], strides = [1, 1]} : vector<16x28xf32> to vector<16x1xf32>
    %8 = vector.broadcast %7 : vector<16x1xf32> to vector<16x256xf32>
    %9 = arith.mulf %6, %8 : vector<16x256xf32>
    %10 = vector.extract_strided_slice %2 {offsets = [0, 22], sizes = [16, 1], strides = [1, 1]} : vector<16x28xf32> to vector<16x1xf32>
    %11 = vector.broadcast %10 : vector<16x1xf32> to vector<16x256xf32>
    %12 = arith.addf %9, %11 : vector<16x256xf32>
    %13 = arith.negf %12 : vector<16x256xf32>
    %14 = math.exp %13 : vector<16x256xf32>
    %cst_8 = arith.constant 1.000000e+00 : f32
    %15 = vector.broadcast %cst_8 : f32 to vector<16x256xf32>
    %16 = arith.addf %15, %14 : vector<16x256xf32>
    %17 = arith.divf %15, %16 : vector<16x256xf32>
    %18 = arith.mulf %12, %17 : vector<16x256xf32>
    %cst_9 = arith.constant 0.000000e+00 : f32
    %19 = vector.broadcast %cst_9 : f32 to vector<16x256xf32>
    %20 = vector.extract_strided_slice %2 {offsets = [0, 8], sizes = [16, 1], strides = [1, 1]} : vector<16x28xf32> to vector<16x1xf32>
    %21 = vector.extract_strided_slice %4 {offsets = [0, 0], sizes = [1, 256], strides = [1, 1]} : vector<9x256xf32> to vector<1x256xf32>
    %22 = vector.broadcast %20 : vector<16x1xf32> to vector<16x256xf32>
    %23 = vector.broadcast %21 : vector<1x256xf32> to vector<16x256xf32>
    %24 = arith.mulf %22, %23 : vector<16x256xf32>
    %c17_i32 = arith.constant 17 : i32
    %25 = tpu.dynamic_rotate %18 by %c17_i32 dim 1 : vector<16x256xf32>, i32 -> vector<16x256xf32>
    %26 = arith.mulf %25, %24 : vector<16x256xf32>
    %27 = arith.addf %19, %26 : vector<16x256xf32>
    %28 = vector.extract_strided_slice %2 {offsets = [0, 9], sizes = [16, 1], strides = [1, 1]} : vector<16x28xf32> to vector<16x1xf32>
    %29 = vector.extract_strided_slice %4 {offsets = [1, 0], sizes = [1, 256], strides = [1, 1]} : vector<9x256xf32> to vector<1x256xf32>
    %30 = vector.broadcast %28 : vector<16x1xf32> to vector<16x256xf32>
    %31 = vector.broadcast %29 : vector<1x256xf32> to vector<16x256xf32>
    %32 = arith.mulf %30, %31 : vector<16x256xf32>
    %c16_i32 = arith.constant 16 : i32
    %33 = tpu.dynamic_rotate %18 by %c16_i32 dim 1 : vector<16x256xf32>, i32 -> vector<16x256xf32>
    %34 = arith.mulf %33, %32 : vector<16x256xf32>
    %35 = arith.addf %27, %34 : vector<16x256xf32>
    %36 = vector.extract_strided_slice %2 {offsets = [0, 10], sizes = [16, 1], strides = [1, 1]} : vector<16x28xf32> to vector<16x1xf32>
    %37 = vector.extract_strided_slice %4 {offsets = [2, 0], sizes = [1, 256], strides = [1, 1]} : vector<9x256xf32> to vector<1x256xf32>
    %38 = vector.broadcast %36 : vector<16x1xf32> to vector<16x256xf32>
    %39 = vector.broadcast %37 : vector<1x256xf32> to vector<16x256xf32>
    %40 = arith.mulf %38, %39 : vector<16x256xf32>
    %c15_i32 = arith.constant 15 : i32
    %41 = tpu.dynamic_rotate %18 by %c15_i32 dim 1 : vector<16x256xf32>, i32 -> vector<16x256xf32>
    %42 = arith.mulf %41, %40 : vector<16x256xf32>
    %43 = arith.addf %35, %42 : vector<16x256xf32>
    %44 = vector.extract_strided_slice %2 {offsets = [0, 11], sizes = [16, 1], strides = [1, 1]} : vector<16x28xf32> to vector<16x1xf32>
    %45 = vector.extract_strided_slice %4 {offsets = [3, 0], sizes = [1, 256], strides = [1, 1]} : vector<9x256xf32> to vector<1x256xf32>
    %46 = vector.broadcast %44 : vector<16x1xf32> to vector<16x256xf32>
    %47 = vector.broadcast %45 : vector<1x256xf32> to vector<16x256xf32>
    %48 = arith.mulf %46, %47 : vector<16x256xf32>
    %c1_i32 = arith.constant 1 : i32
    %49 = tpu.dynamic_rotate %18 by %c1_i32 dim 1 : vector<16x256xf32>, i32 -> vector<16x256xf32>
    %50 = arith.mulf %49, %48 : vector<16x256xf32>
    %51 = arith.addf %43, %50 : vector<16x256xf32>
    %52 = vector.extract_strided_slice %2 {offsets = [0, 12], sizes = [16, 1], strides = [1, 1]} : vector<16x28xf32> to vector<16x1xf32>
    %53 = vector.extract_strided_slice %4 {offsets = [4, 0], sizes = [1, 256], strides = [1, 1]} : vector<9x256xf32> to vector<1x256xf32>
    %54 = vector.broadcast %52 : vector<16x1xf32> to vector<16x256xf32>
    %55 = vector.broadcast %53 : vector<1x256xf32> to vector<16x256xf32>
    %56 = arith.mulf %54, %55 : vector<16x256xf32>
    %57 = arith.mulf %18, %56 : vector<16x256xf32>
    %58 = arith.addf %51, %57 : vector<16x256xf32>
    %59 = vector.extract_strided_slice %2 {offsets = [0, 13], sizes = [16, 1], strides = [1, 1]} : vector<16x28xf32> to vector<16x1xf32>
    %60 = vector.extract_strided_slice %4 {offsets = [5, 0], sizes = [1, 256], strides = [1, 1]} : vector<9x256xf32> to vector<1x256xf32>
    %61 = vector.broadcast %59 : vector<16x1xf32> to vector<16x256xf32>
    %62 = vector.broadcast %60 : vector<1x256xf32> to vector<16x256xf32>
    %63 = arith.mulf %61, %62 : vector<16x256xf32>
    %c255_i32 = arith.constant 255 : i32
    %64 = tpu.dynamic_rotate %18 by %c255_i32 dim 1 : vector<16x256xf32>, i32 -> vector<16x256xf32>
    %65 = arith.mulf %64, %63 : vector<16x256xf32>
    %66 = arith.addf %58, %65 : vector<16x256xf32>
    %67 = vector.extract_strided_slice %2 {offsets = [0, 14], sizes = [16, 1], strides = [1, 1]} : vector<16x28xf32> to vector<16x1xf32>
    %68 = vector.extract_strided_slice %4 {offsets = [6, 0], sizes = [1, 256], strides = [1, 1]} : vector<9x256xf32> to vector<1x256xf32>
    %69 = vector.broadcast %67 : vector<16x1xf32> to vector<16x256xf32>
    %70 = vector.broadcast %68 : vector<1x256xf32> to vector<16x256xf32>
    %71 = arith.mulf %69, %70 : vector<16x256xf32>
    %c241_i32 = arith.constant 241 : i32
    %72 = tpu.dynamic_rotate %18 by %c241_i32 dim 1 : vector<16x256xf32>, i32 -> vector<16x256xf32>
    %73 = arith.mulf %72, %71 : vector<16x256xf32>
    %74 = arith.addf %66, %73 : vector<16x256xf32>
    %75 = vector.extract_strided_slice %2 {offsets = [0, 15], sizes = [16, 1], strides = [1, 1]} : vector<16x28xf32> to vector<16x1xf32>
    %76 = vector.extract_strided_slice %4 {offsets = [7, 0], sizes = [1, 256], strides = [1, 1]} : vector<9x256xf32> to vector<1x256xf32>
    %77 = vector.broadcast %75 : vector<16x1xf32> to vector<16x256xf32>
    %78 = vector.broadcast %76 : vector<1x256xf32> to vector<16x256xf32>
    %79 = arith.mulf %77, %78 : vector<16x256xf32>
    %c240_i32 = arith.constant 240 : i32
    %80 = tpu.dynamic_rotate %18 by %c240_i32 dim 1 : vector<16x256xf32>, i32 -> vector<16x256xf32>
    %81 = arith.mulf %80, %79 : vector<16x256xf32>
    %82 = arith.addf %74, %81 : vector<16x256xf32>
    %83 = vector.extract_strided_slice %2 {offsets = [0, 16], sizes = [16, 1], strides = [1, 1]} : vector<16x28xf32> to vector<16x1xf32>
    %84 = vector.extract_strided_slice %4 {offsets = [8, 0], sizes = [1, 256], strides = [1, 1]} : vector<9x256xf32> to vector<1x256xf32>
    %85 = vector.broadcast %83 : vector<16x1xf32> to vector<16x256xf32>
    %86 = vector.broadcast %84 : vector<1x256xf32> to vector<16x256xf32>
    %87 = arith.mulf %85, %86 : vector<16x256xf32>
    %c239_i32 = arith.constant 239 : i32
    %88 = tpu.dynamic_rotate %18 by %c239_i32 dim 1 : vector<16x256xf32>, i32 -> vector<16x256xf32>
    %89 = arith.mulf %88, %87 : vector<16x256xf32>
    %90 = arith.addf %82, %89 : vector<16x256xf32>
    %91 = vector.extract_strided_slice %2 {offsets = [0, 23], sizes = [16, 1], strides = [1, 1]} : vector<16x28xf32> to vector<16x1xf32>
    %92 = vector.broadcast %91 : vector<16x1xf32> to vector<16x256xf32>
    %93 = arith.mulf %90, %92 : vector<16x256xf32>
    %94 = vector.extract_strided_slice %2 {offsets = [0, 24], sizes = [16, 1], strides = [1, 1]} : vector<16x28xf32> to vector<16x1xf32>
    %95 = vector.broadcast %94 : vector<16x1xf32> to vector<16x256xf32>
    %96 = arith.addf %93, %95 : vector<16x256xf32>
    %97 = arith.negf %96 : vector<16x256xf32>
    %98 = math.exp %97 : vector<16x256xf32>
    %cst_10 = arith.constant 1.000000e+00 : f32
    %99 = vector.broadcast %cst_10 : f32 to vector<16x256xf32>
    %100 = arith.addf %99, %98 : vector<16x256xf32>
    %101 = arith.divf %99, %100 : vector<16x256xf32>
    %102 = arith.mulf %96, %101 : vector<16x256xf32>
    %cst_11 = arith.constant dense<0.000000e+00> : vector<16xf32>
    %103 = vector.multi_reduction <add>, %102, %cst_11 [1] : vector<16x256xf32> to vector<16xf32>
    %104 = vector.shape_cast %103 : vector<16xf32> to vector<16x1xf32>
    %cst_12 = arith.constant 2.560000e+02 : f32
    %105 = vector.broadcast %cst_12 : f32 to vector<16x1xf32>
    %106 = arith.divf %104, %105 : vector<16x1xf32>
    %107 = vector.extract_strided_slice %2 {offsets = [0, 17], sizes = [16, 2], strides = [1, 1]} : vector<16x28xf32> to vector<16x2xf32>
    %108 = vector.broadcast %106 : vector<16x1xf32> to vector<16x2xf32>
    %109 = arith.mulf %107, %108 : vector<16x2xf32>
    %cst_13 = arith.constant dense<0.000000e+00> : vector<2xf32>
    %110 = vector.multi_reduction <add>, %109, %cst_13 [0] : vector<16x2xf32> to vector<2xf32>
    %111 = vector.shape_cast %110 : vector<2xf32> to vector<1x2xf32>
    %112 = vector.extract_strided_slice %2 {offsets = [0, 26], sizes = [1, 2], strides = [1, 1]} : vector<16x28xf32> to vector<1x2xf32>
    %113 = arith.addf %111, %112 : vector<1x2xf32>
    %114 = arith.negf %113 : vector<1x2xf32>
    %115 = math.exp %114 : vector<1x2xf32>
    %cst_14 = arith.constant 1.000000e+00 : f32
    %116 = vector.broadcast %cst_14 : f32 to vector<1x2xf32>
    %117 = arith.addf %116, %115 : vector<1x2xf32>
    %118 = arith.divf %116, %117 : vector<1x2xf32>
    %119 = arith.mulf %113, %118 : vector<1x2xf32>
    %120 = vector.extract_strided_slice %2 {offsets = [0, 19], sizes = [16, 2], strides = [1, 1]} : vector<16x28xf32> to vector<16x2xf32>
    %121 = vector.broadcast %119 : vector<1x2xf32> to vector<16x2xf32>
    %122 = arith.mulf %120, %121 : vector<16x2xf32>
    %cst_15 = arith.constant dense<0.000000e+00> : vector<16xf32>
    %123 = vector.multi_reduction <add>, %122, %cst_15 [1] : vector<16x2xf32> to vector<16xf32>
    %124 = vector.shape_cast %123 : vector<16xf32> to vector<16x1xf32>
    %125 = vector.extract_strided_slice %2 {offsets = [0, 25], sizes = [16, 1], strides = [1, 1]} : vector<16x28xf32> to vector<16x1xf32>
    %126 = arith.addf %124, %125 : vector<16x1xf32>
    %127 = arith.negf %126 : vector<16x1xf32>
    %128 = math.exp %127 : vector<16x1xf32>
    %cst_16 = arith.constant 1.000000e+00 : f32
    %129 = vector.broadcast %cst_16 : f32 to vector<16x1xf32>
    %130 = arith.addf %129, %128 : vector<16x1xf32>
    %131 = arith.divf %129, %130 : vector<16x1xf32>
    %132 = vector.broadcast %131 : vector<16x1xf32> to vector<16x256xf32>
    %133 = arith.mulf %102, %132 : vector<16x256xf32>
    %134 = vector.extract_strided_slice %3 {offsets = [0, 0], sizes = [8, 16], strides = [1, 1]} : vector<8x18xf32> to vector<8x16xf32>
    %cst_17 = arith.constant dense<0.000000e+00> : vector<8x256xf32>
    %135 = tpu.matmul %134, %133, %cst_17 {dimension_numbers = #tpu.dot_dimension_numbers<[1], [0], [0], [1], [0, 0, 1, 1], [], []>} : vector<8x16xf32>, vector<16x256xf32>, vector<8x256xf32> -> vector<8x256xf32>
    %136 = vector.extract_strided_slice %3 {offsets = [0, 16], sizes = [8, 1], strides = [1, 1]} : vector<8x18xf32> to vector<8x1xf32>
    %137 = vector.broadcast %136 : vector<8x1xf32> to vector<8x256xf32>
    %138 = arith.mulf %135, %137 : vector<8x256xf32>
    %139 = vector.extract_strided_slice %3 {offsets = [0, 17], sizes = [8, 1], strides = [1, 1]} : vector<8x18xf32> to vector<8x1xf32>
    %140 = vector.broadcast %139 : vector<8x1xf32> to vector<8x256xf32>
    %141 = arith.addf %138, %140 : vector<8x256xf32>
    %142 = arith.addf %141, %1 : vector<8x256xf32>
    %c0_18 = arith.constant 0 : index
    %c0_19 = arith.constant 0 : index
    %c0_20 = arith.constant 0 : index
    %143 = vector.load %arg5[%c0_18, %c0_19, %c0_20] : memref<1x8x256xf32, #tpu.memory_space<vmem>>, vector<1x8x256xf32>
    %144 = vector.shape_cast %143 : vector<1x8x256xf32> to vector<8x256xf32>
    %145 = vector.shape_cast %142 : vector<8x256xf32> to vector<1x8x256xf32>
    tpu.vector_store %arg5[%c0_18, %c0_19, %c0_20], %145 {strides = array<i32>} : memref<1x8x256xf32, #tpu.memory_space<vmem>>, vector<1x8x256xf32>,
    return
  }
  func.func @transform_0(%arg0: i32) -> (i32, i32, i32) {
    %c0_i32 = arith.constant 0 : i32
    %c0_i32_0 = arith.constant 0 : i32
    %c0_i32_1 = arith.constant 0 : i32
    return %arg0, %c0_i32, %c0_i32_0 : i32, i32, i32
  }
  func.func @transform_1(%arg0: i32) -> (i32, i32) {
    %c0_i32 = arith.constant 0 : i32
    %c0_i32_0 = arith.constant 0 : i32
    %c0_i32_1 = arith.constant 0 : i32
    return %c0_i32, %c0_i32_0 : i32, i32
  }
  func.func @transform_2(%arg0: i32) -> (i32, i32) {
    %c0_i32 = arith.constant 0 : i32
    %c0_i32_0 = arith.constant 0 : i32
    %c0_i32_1 = arith.constant 0 : i32
    return %c0_i32, %c0_i32_0 : i32, i32
  }
  func.func @transform_3(%arg0: i32) -> (i32, i32) {
    %c0_i32 = arith.constant 0 : i32
    %c0_i32_0 = arith.constant 0 : i32
    %c0_i32_1 = arith.constant 0 : i32
    return %c0_i32, %c0_i32_0 : i32, i32
  }
  func.func @transform_4(%arg0: i32) -> (i32, i32, i32) {
    %c0_i32 = arith.constant 0 : i32
    %c0_i32_0 = arith.constant 0 : i32
    %c0_i32_1 = arith.constant 0 : i32
    return %arg0, %c0_i32, %c0_i32_0 : i32, i32, i32
  }
}

</mosaic_0001>

<bundles_post_ra>
// kernel: tpu_custom_call.1
= control target key start
LH: loop header
LB: loop body
LE: loop exit
PB: predicated region body
PF: predicated region fallthrough
CT: control target
= control target key end

     0   :  { %9 = vsyncpa [#allocation3], 0  ;;  %s2124_s0 = inlined_call_operand.hbm [shape: f32[2,8,256], index: 0, kind: input, shape index: {}]   ;;  %s2125_s1 = inlined_call_operand.hbm [shape: f32[16,28], index: 1, kind: input, shape index: {}]   ;;  %s2126_s2 = inlined_call_operand.hbm [shape: f32[8,18], index: 2, kind: input, shape index: {}]   ;;  %s2127_s3 = inlined_call_operand.hbm [shape: f32[9,256], index: 3, kind: input, shape index: {}]   ;;  %s2128_s4 = inlined_call_operand.hbm [shape: f32[2,8,256], index: 4, kind: output, shape index: {}]  }
   0x1   :  { %11 = vsyncpa [#allocation3 + $0x1], 0 }
   0x2   :  { %12 = vsyncpa [#allocation6], 0 }
   0x3   :  { %13 = vsyncpa [#allocation9], 0 }
   0x4   :  { %14 = vsyncpa [#allocation4], 0 }
   0x5   :  { %16 = vsyncpa [#allocation4 + $0x1], 0  ;;  %s1560_s15 = smov 0   ;;  %s1562_s16 = smov 0  }
   0x6   :  { %s1564_s17 = smov 0   ;;  %s1566_s18 = smov 0  }
   0x7 LB: > { %s1581_s19 = sadd.s32 4294967295, %s1497_s18   ;;  %s1101_s20 = sadd.s32 4294967294, %s1497_s18   ;;  %s1497_s18 = sphi %s1566_s18, %s2189_s18   ;;  %s1493_s17 = sphi %s1564_s17, %s2188_s17   ;;  %s1489_s16 = sphi %s1562_s16, %s2187_s16   ;;  %s1485_s15 = sphi %s1560_s15, %s2186_s15  }
   0x8   : > { %p42_p0 = scmp.ne.s32.totalorder %s1489_s16, %s1485_s15  ;;  %p2129_p1 = scmp.eq.s32.totalorder %s1581_s19, 0 }
   0x9   : > { %p135_p3 = scmp.eq.s32.totalorder %s1101_s20, 1  ;;  %p1102_p5 = scmp.ge.s32.totalorder %s1497_s18, 1 }
   0xa   : > { %p1590_p4 = por %p2129_p1, %p42_p0  ;;  %p142_p7 = scmp.lt.s32.totalorder %s1497_s18, 3 }
   0xb   : > { %p1595_p6 = por %p135_p3, %p42_p0  ;;  %s1499_s24 = smov [#allocation5]  }
   0xc   : > { %s2147_s21 = scalar_select %p1590_p4, 1, 0 }
   0xd   : > { %s2148_s22 = scalar_select %p1595_p6, 1, 0 }
   0xe   : > { %p1600_p8 = pnand %p1102_p5, %p142_p7  ;;  %s154_s25 = sshll.u32 %s1499_s24, 4  ;;  %s155_s25 = int_to_ptr.vmem [resolvable:$true] %s154_s25 }
   0xf   : > { %s1500_s27 = smov [#allocation7]   ;;  %s1501_s29 = smov [#allocation8]  }
  0x10   : > { %s2149_s23 = scalar_select %p1600_p8, 1, 0 }
  0x11   : > { %p1155_p9 = pneg %p1600_p8  ;;  %s168_s28 = sshll.u32 %s1500_s27, 4  ;;  %s169_s28 = int_to_ptr.vmem [resolvable:$true] %s168_s28 }
  0x12   : > { %s178_s30 = sshll.u32 %s1501_s29, 4  ;;  %s1330_s5 = scalar_lea.vmem %s155_s25, 256  ;;  %s179_s30 = int_to_ptr.vmem [resolvable:$true] %s178_s30 }
  0x13   : > { %p1609_p11 = pnand %p1155_p9, %p2129_p1  ;;  %p1331_p13 = scmp.ne.s32.totalorder %s155_s25, %s1330_s5 }
  0x14   : > { %p1338_p5 = scmp.lt.s32.totalorder %s155_s25, %s155_s25  ;;  %p1339_p7 = scmp.lt.s32.totalorder %s1330_s5, %s1330_s5 }
  0x15   : > { %p1321_p12 = pneg %p1609_p11 }
  0x16   : > { %p1340_p9 = por %p1339_p7, %p1338_p5 }
  0x17   : > { %p1333_p0 = pnand %p1331_p13, %p1321_p12 }
  0x19   : > { %p1334_p3 = pneg %p1333_p0 }
  0x1b   : > { %p1341_p10 = pnand %p1340_p9, %p1334_p3 }
  0x1d   : > { %1344 = shalt.err (!%p1341_p10)
}
  0x1e   : > { %s1502_s6 = smov 128   ;;  %s1503_s7 = smov 8  }
  0x1f   : > { %1158 = dma.hbm_to_vmem [thread:$0]  (!%p1609_p11), %s2125_s1, 256, %s155_s25, [#allocation6], %s1502_s6, %s1502_s6, %s1503_s7  }
  0x20   : > { %s1356_s10 = scalar_lea.vmem %s169_s28, 128  ;;  %p1364_p2 = scmp.lt.s32.totalorder %s169_s28, %s169_s28 }
  0x21   : > { %p1357_p1 = scmp.ne.s32.totalorder %s169_s28, %s1356_s10  ;;  %p1365_p6 = scmp.lt.s32.totalorder %s1356_s10, %s1356_s10 }
  0x23   : > { %p1359_p13 = pnand %p1357_p1, %p1321_p12  ;;  %p1366_p5 = por %p1365_p6, %p1364_p2 }
  0x25   : > { %p1360_p0 = pneg %p1359_p13 }
  0x27   : > { %p1367_p3 = pnand %p1366_p5, %p1360_p0 }
  0x29   : > { %1370 = shalt.err (!%p1367_p3)
}
  0x2a   : > { %1161 = dma.hbm_to_vmem [thread:$0]  (!%p1609_p11), %s2126_s2, 128, %s169_s28, [#allocation6]  }
  0x2b   : > { %s1382_s13 = scalar_lea.vmem %s179_s30, 512  ;;  %p1390_p9 = scmp.lt.s32.totalorder %s179_s30, %s179_s30 }
  0x2c   : > { %p1383_p10 = scmp.ne.s32.totalorder %s179_s30, %s1382_s13  ;;  %p1391_p13 = scmp.lt.s32.totalorder %s1382_s13, %s1382_s13 }
  0x2e   : > { %p1385_p7 = pnand %p1383_p10, %p1321_p12  ;;  %p1392_p4 = por %p1391_p13, %p1390_p9 }
  0x30   : > { %p1386_p1 = pneg %p1385_p7 }
  0x32   : > { %p1393_p2 = pnand %p1392_p4, %p1386_p1 }
  0x34   : > { %1396 = shalt.err (!%p1393_p2)
}
  0x35   : > { %s1504_s14 = smov 256   ;;  %s1505_s20 = smov 16  }
  0x36   : > { %1164 = dma.hbm_to_vmem [thread:$0]  (!%p1609_p11), %s2127_s3, 512, %s179_s30, [#allocation9], %s1504_s14, %s1504_s14, %s1505_s20  }
  0x37   : > { %s1640_s27 = sadd.s32 1, %s1497_s18   ;;  %s29_s29 = sadd.s32 1, %s1493_s17 }
  0x38   : > { %s26_s28 = ssub.s32 %s1497_s18, %s1640_s27  ;;  %p36_p6 = scmp.ne.s32.totalorder %s1493_s17, %s1489_s16 }
  0x39   : > { %p27_p4 = scmp.eq.s32.totalorder %s26_s28, 0  ;;  %p37_p12 = scmp.eq.s32.totalorder %s1497_s18, 0 }
  0x3a   : > { %p1176_p0 = scmp.lt.s32.totalorder %s1497_s18, 2  ;;  %p2151_p3 = scmp.eq.s32.totalorder %s1581_s19, 1 }
  0x3b   : > { %s1650_s5 = scalar_select %p27_p4, %s1493_s17, %s29_s29  }
  0x3c   : > { %p38_p5 = por %p37_p12, %p36_p6  ;;  %p1654_p10 = por %p2151_p3, %p36_p6 }
  0x3d   : > { %s192_s26 = sand.u32 1, %s1493_s17   ;;  %s1137_s7 = sshll.u32 %s1497_s18, 8 }
  0x3e   : > { %s2152_s6 = scalar_select %p1654_p10, 1, 0 }
  0x3f   : > { %s1107_s30 = sshll.u32 %s192_s26, 4  ;;  %s1663_s10 = scalar_lea.hbm %s2124_s0, %s1137_s7 }
  0x40   : > { %s196_s11 = scalar_lea.vmem [#allocation2], %s1107_s30  ;;  %p1665_p11 = pnand %p1176_p0, %p38_p5 }
  0x41   : > { %s204_s12 = sshll.u32 %s196_s11, 4  ;;  %s193_s14 = scalar_lea.sflag [#allocation3], %s192_s26  ;;  %s205_s12 = int_to_ptr.vmem [resolvable:$true] %s204_s12 }
  0x42   : > { %s1397_s20 = scalar_lea.hbm %s1663_s10, 256  ;;  %p1399_p1 = pneg %p1665_p11 }
  0x43   : > { %p1398_p7 = scmp.ne.s32.totalorder %s1663_s10, %s1397_s20  ;;  %s1402_s28 = scalar_lea.hbm %s2124_s0, 512 }
  0x44   : > { %p1403_p2 = scmp.lt.s32.totalorder %s1663_s10, %s2124_s0  ;;  %p1404_p4 = scmp.lt.s32.totalorder %s1402_s28, %s1397_s20 }
  0x45   : > { %p1400_p9 = pnand %p1399_p1, %p1398_p7 }
  0x46   : > { %p1405_p6 = por %p1404_p4, %p1403_p2 }
  0x47   : > { %p1401_p13 = pneg %p1400_p9 }
  0x49   : > { %p1406_p12 = pnand %p1405_p6, %p1401_p13 }
  0x4b   : > { %1409 = shalt.err (!%p1406_p12)
}
  0x4c   : > { %s1410_s30 = scalar_lea.vmem %s205_s12, 256  ;;  %s1506_s26 = smov [#allocation2]  }
  0x4d   : > { %p1411_p0 = scmp.ne.s32.totalorder %s205_s12, %s1410_s30  ;;  %s1415_s8 = sshll.u32 %s1506_s26, 4  ;;  %s1416_s8 = int_to_ptr.vmem [resolvable:$false] %s1415_s8 }
  0x4e   : > { %s1417_s9 = scalar_lea.vmem %s1416_s8, 512  ;;  %p1418_p7 = scmp.lt.s32.totalorder %s205_s12, %s1416_s8 }
  0x4f   : > { %p1413_p5 = pnand %p1411_p0, %p1399_p1  ;;  %p1419_p9 = scmp.lt.s32.totalorder %s1417_s9, %s1410_s30 }
  0x51   : > { %p1414_p3 = pneg %p1413_p5  ;;  %p1420_p10 = por %p1419_p9, %p1418_p7 }
  0x53   : > { %p1421_p8 = pnand %p1420_p10, %p1414_p3 }
  0x55   : > { %1424 = shalt.err (!%p1421_p8)
}
  0x56   : > { %1168 = dma.hbm_to_vmem [thread:$0]  (!%p1665_p11), %s1663_s10, 256, %s205_s12, %s193_s14  }
  0x57   : > { %p2154_p13 = scmp.ne.s32.totalorder %s2149_s23, 0 }
  0x59   : > { %213 = sbr.rel (%p2154_p13) target bundleno = 1528 (0x5f8), region = 36 }
  0x5e   : > { %s1686_s11 = sand.u32 1, %s1489_s16   ;;  %p2155_p8 = scmp.ne.s32.totalorder %s2147_s21, 0 }
  0x5f   : > { %s1111_s20 = sshll.u32 %s1686_s11, 4  ;;  %s216_s24 = scalar_lea.sflag [#allocation3], %s1686_s11 }
  0x60   : > { %s1692_s25 = scalar_lea.vmem [#allocation2], %s1111_s20 }
  0x61   : > { %1468 = dma.done.wait (%p2155_p8), %s216_s24, 256  }
  0x62   : > { %1470 = vsyncadd (%p2155_p8), %s216_s24, 4294967040  ;;  %p2156_p10 = scmp.eq.s32.totalorder %s1581_s19, 0 }
  0x64   : > { %1472 = dma.done.wait (%p2156_p10), [#allocation6], 384   ;;  %p2157_p11 = pmov %p2156_p10 }
  0x65   : > { %p2158_p1 = pmov %p2156_p10 }
  0x66   : > { %1474 = vsyncadd (%p2157_p11), [#allocation6], 4294966912 }
  0x67   : > { %1476 = dma.done.wait (%p2158_p1), [#allocation9], 512   ;;  %p2159_p2 = pmov %p2158_p1 }
  0x68   : > { %v1507_v0 = vmov 0.0   ;;  %v1508_v1 = vmov 21   ;;  %v1509_v2 = vmov 22   ;;  %v257_v3 = vld [vmem:[%s1692_s25 + $0x8] sm:$0xff]  ;;  %v256_v4 = vld [vmem:[%s1692_s25] sm:$0xff]  ;;  %vm265_vm0 = vcmask 64512  }
  0x69   : > { %1478 = vsyncadd (%p2159_p2), [#allocation9], 4294966784  ;;  %336 = vmatprep.mubr.f32.mxu0 %v1507_v0  ;;  %1247 = vset.pattern.permute.xlu0 %v1508_v1  ;;  %v1708_v5 = vld [vmem:[#allocation5] sm:$0xff]  ;;  %v1713_v6 = vld [vmem:[#allocation5 + $0x8] sm:$0xff]  ;;  %v1510_v7 = vmov 8   ;;  %v1511_v8 = vmov 9   ;;  %v409_v36 = vlaneseq }
  0x6a   : > { %1248 = vset.pattern.permute.xlu1 %v1509_v2  ;;  %964 = vmatprep.mubr.f32.mxu1 %v1507_v0  ;;  %2160 = vst [vmem:[#allocation15_spill] sm:$0xff] %v1708_v5  ;;  %2161 = vst [vmem:[#allocation16_spill] sm:$0xff] %v1713_v6  ;;  %v1512_v9 = vmov 11   ;;  %v1513_v10 = vmov 10   ;;  %v1514_v11 = vmov 12   ;;  %v1515_v12 = vmov 13  }
  0x6b   : > { %302 = vmatprep.subr.mxu0 %v257_v3  ;;  %350 = vperm.xlu0 %1247, %v1708_v5   ;;  %v1516_v13 = vmov 14   ;;  %v1517_v14 = vmov 15   ;;  %v2133_v15 = vmov 16   ;;  %v1519_v16 = vmov 23   ;;  %v1752_v48 = vld [vmem:[#allocation8] sm:$0xff]  ;;  %v1754_v51 = vld [vmem:[#allocation8 + $0x8] sm:$0xff] }
  0x6c   : > { %303 = vmatpush1.msra.mxu0 %v256_v4  ;;  %362 = vperm.xlu1 %1248, %v1708_v5   ;;  %v1747_v43 = vshrl.u32 %v409_v36, 7  ;;  %s1520_s21 = smov 127   ;;  %s1521_s23 = smov 17   ;;  %vm822_vm9 = vcmask 154760   ;;  %vm861_vm10 = vcmask 15360   ;;  %vm896_vm11 = vcmask 130048  }
  0x6d   : > { %1116 = vmatmul.mubr.msk.f32.vlgmr.msra.gmra.mxu0 %vm265_vm0, %v1708_v5  ;;  %s1522_s10 = smov 16   ;;  %s1523_s12 = smov 15  }
  0x6e   : > { %342 = vmatprep.mubr.f32.mxu0 %v1507_v0  ;;  %v577_v47 = vsub.s32 4, %v1747_v43  ;;  %s1524_s13 = smov 1   ;;  %s1525_s14 = smov 113  }
  0x6f   : > { %354 = vperm.xlu0 %1247, %v1713_v6   ;;  %s1526_s28 = smov 112   ;;  %s1527_s29 = smov 111  }
  0x70   : > { %366 = vperm.xlu1 %1248, %v1713_v6   ;;  %v1757_v52 = vrot.slane %v1752_v48, %v577_v47  ;;  %v1760_v55 = vrot.slane %v1754_v51, %v577_v47  ;;  %s1529_s7 = smov 119   ;;  %s1530_s30 = smov 2  }
  0x71   : > { %1117 = vmatmul.mubr.msk.f32.gmra.mxu0 %vm265_vm0, %v1713_v6  ;;  %s1531_s26 = smov 109   ;;  %s1138_s8 = sshll.u32 %s1581_s19, 8 }
  0x72   : > { %s255_s9 = scalar_lea.vmem [#allocation10], %s1111_s20  ;;  %p2183_p6 = scmp.ne.s32.totalorder %s2152_s6, 0 }
  0x73   : > { %1249 = vset.pattern.permute.xlu0 %v1510_v7  ;;  %s1002_s24 = sshll.u32 %s255_s9, 4  ;;  %s1534_s19 = smov [#allocation10]   ;;  %s1003_s24 = int_to_ptr.vmem [resolvable:$true] %s1002_s24 }
  0x74   : > { %1250 = vset.pattern.permute.xlu1 %v1510_v7  ;;  %402 = vperm.xlu0 %1249, %v1708_v5   ;;  %s1429_s20 = sshll.u32 %s1534_s19, 4  ;;  %s1430_s20 = int_to_ptr.vmem [resolvable:$false] %s1429_s20 }
  0x75   : > { %406 = vperm.xlu1 %1250, %v1713_v6   ;;  %p1432_p5 = scmp.lt.s32.totalorder %s1003_s24, %s1430_s20 }
  0x78   : > { %1252 = vset.pattern.permute.xlu0 %v1511_v8 }
  0x79   : > { %1251 = vset.pattern.permute.xlu1 %v1511_v8  ;;  %449 = vperm.xlu0 %1252, %v1713_v6   ;;  %v1528_v8 = vmov 24  }
  0x7a   : > { %445 = vperm.xlu1 %1251, %v1708_v5  }
  0x7d   : > { %1254 = vset.pattern.permute.xlu0 %v1512_v9 }
  0x7e   : > { %1253 = vset.pattern.permute.xlu1 %v1513_v10  ;;  %527 = vperm.xlu0 %1254, %v1708_v5  }
  0x7f   : > { %486 = vperm.xlu1 %1253, %v1708_v5  }
  0x82   : > { %1257 = vset.pattern.permute.xlu0 %v1514_v11 }
  0x83   : > { %490 = vperm.xlu1 %1253, %v1713_v6   ;;  %572 = vperm.xlu0 %1257, %v1713_v6  }
  0x87   : > { %1255 = vset.pattern.permute.xlu1 %v1512_v9  ;;  %1258 = vset.pattern.permute.xlu0 %v1515_v12 }
  0x88   : > { %531 = vperm.xlu1 %1255, %v1713_v6   ;;  %596 = vperm.xlu0 %1258, %v1708_v5  }
  0x8c   : > { %1256 = vset.pattern.permute.xlu1 %v1514_v11  ;;  %1261 = vset.pattern.permute.xlu0 %v1516_v13 }
  0x8d   : > { %568 = vperm.xlu1 %1256, %v1708_v5   ;;  %641 = vperm.xlu0 %1261, %v1713_v6  }
  0x91   : > { %1259 = vset.pattern.permute.xlu1 %v1515_v12  ;;  %1263 = vset.pattern.permute.xlu0 %v2133_v15 }
  0x92   : > { %600 = vperm.xlu1 %1259, %v1713_v6   ;;  %719 = vperm.xlu0 %1263, %v1708_v5  }
  0x96   : > { %1260 = vset.pattern.permute.xlu1 %v1516_v13  ;;  %1266 = vset.pattern.permute.xlu0 %v1519_v16 }
  0x97   : > { %637 = vperm.xlu1 %1260, %v1708_v5  }
  0x9b   : > { %1262 = vset.pattern.permute.xlu1 %v1517_v14 }
  0x9c   : > { %678 = vperm.xlu1 %1262, %v1708_v5  }
  0xa0   : > { %682 = vperm.xlu1 %1262, %v1713_v6  }
  0xa4   : > { %1264 = vset.pattern.permute.xlu1 %v2133_v15 }
  0xa5   : > { %723 = vperm.xlu1 %1264, %v1713_v6  }
  0xa9   : > { %1265 = vset.pattern.permute.xlu1 %v1519_v16 }
  0xe6   : > { %v351_v18 = vpop.permute.xlu0 %350 }
  0xe7   : > { %v363_v17 = vpop.permute.xlu1 %362 }
  0xea   : > { %v355_v26 = vpop.permute.xlu0 %354 }
  0xeb   : > { %v367_v19 = vpop.permute.xlu1 %366 }
  0xef   : > { %v403_v9 = vpop.permute.xlu0 %402 }
  0xf0   : > { %v1738_v23 = vpop.permute.xlu1 %406 }
  0xf4   : > { %v450_v10 = vpop.permute.xlu0 %449 }
  0xf5   : > { %v1740_v33 = vpop.permute.xlu1 %445 }
  0xf9   : > { %v528_v12 = vpop.permute.xlu0 %527 }
  0xfa   : > { %v1742_v35 = vpop.permute.xlu1 %486 }
  0xfe   : > { %v1744_v38 = vpop.permute.xlu1 %490  ;;  %v1812_v14 = vpop.permute.xlu0 %572 }
 0x103   : > { %v1749_v46 = vpop.permute.xlu1 %531 }
 0x108   : > { %v569_v53 = vpop.permute.xlu1 %568 }
 0x109   : > { %v583_v56 = vmul.f32 %v1757_v52, %v569_v53  ;;  %v584_v59 = vmul.f32 %v1760_v55, %v569_v53 }
 0x10d   : > { %v1808_v11 = vpop.permute.xlu1 %600 }
 0x10e   : > { %2162 = vst [vmem:[#allocation17_spill] sm:$0xff] %v1808_v11 }
 0x112   : > { %v1810_v13 = vpop.permute.xlu1 %637 }
 0x117   : > { %v1814_v16 = vpop.permute.xlu1 %678 }
 0x12d   : > { %v338_v20 = vpop.f32.mrf.mxu0 }
 0x12e   : > { %v357_v21 = vmul.f32 %v351_v18, %v338_v20 }
 0x12f   : > { %v340_v22 = vpop.f32.mrf.mxu0 }
 0x130   : > { %v369_v24 = vadd.f32 %v363_v17, %v357_v21  ;;  %v358_v25 = vmul.f32 %v351_v18, %v340_v22  ;;  %v1818_v18 = vpop.permute.xlu1 %682 }
 0x131   : > { %v344_v27 = vpop.f32.mrf.mxu0  ;;  %2163 = vst [vmem:[#allocation18_spill] sm:$0xff] %v1818_v18 }
 0x132   : > { %v1118_v28 = vmul.f32 -1.442695, %v369_v24  ;;  %v370_v29 = vadd.f32 %v363_v17, %v358_v25  ;;  %v359_v30 = vmul.f32 %v355_v26, %v344_v27  ;;  %v1816_v17 = vpop.permute.xlu0 %596 }
 0x133   : > { %v346_v41 = vpop.f32.mrf.mxu0 }
 0x134   : > { %1273 = vpow2.f32 %v1118_v28  ;;  %v1119_v31 = vmul.f32 -1.442695, %v370_v29  ;;  %v371_v32 = vadd.f32 %v367_v19, %v359_v30  ;;  %v360_v44 = vmul.f32 %v355_v26, %v346_v41  ;;  %v1822_v20 = vpop.permute.xlu1 %723 }
 0x135   : > { %2165 = vst [vmem:[#allocation20_spill] sm:$0xff] %v1822_v20 }
 0x136   : > { %1275 = vpow2.f32 %v1119_v31  ;;  %v1120_v34 = vmul.f32 -1.442695, %v371_v32  ;;  %v372_v50 = vadd.f32 %v367_v19, %v360_v44  ;;  %v1820_v19 = vpop.permute.xlu0 %641 }
 0x137   : > { %2164 = vst [vmem:[#allocation19_spill] sm:$0xff] %v1820_v19 }
 0x138   : > { %1277 = vpow2.f32 %v1120_v34  ;;  %v1121_v54 = vmul.f32 -1.442695, %v372_v50  ;;  %v1839_v34 = vsub.s32 0, %v1747_v43 }
 0x13a   : > { %v1824_v21 = vpop.permute.xlu0 %719  ;;  %2166 = vst [vmem:[#allocation21_spill] sm:$0xff] %v1839_v34  ;;  %v412_v44 = vrot.slane %v1752_v48, %v1839_v34 }
 0x141   : > { %v1274_v37 = vpop.eup %1273 }
 0x142   : > { %v385_v39 = vadd.f32 1.0, %v1274_v37  ;;  %v454_v37 = vsub.s32 1, %v1747_v43 }
 0x143   : > { %v1276_v40 = vpop.eup %1275 }
 0x144   : > { %1279 = vrcp.f32 %v385_v39  ;;  %v386_v42 = vadd.f32 1.0, %v1276_v40  ;;  %v495_v39 = vsub.s32 2, %v1747_v43  ;;  %v455_v47 = vrot.slane %v1752_v48, %v454_v37 }
 0x145   : > { %v1278_v45 = vpop.eup %1277 }
 0x146   : > { %1281 = vrcp.f32 %v386_v42  ;;  %v387_v49 = vadd.f32 1.0, %v1278_v45  ;;  %v536_v42 = vsub.s32 3, %v1747_v43  ;;  %v416_v45 = vrot.slane %v1754_v51, %v1839_v34 }
 0x148   : > { %1283 = vrcp.f32 %v387_v49  ;;  %v459_v49 = vrot.slane %v1754_v51, %v454_v37  ;;  %v646_v37 = vsub.s32 6, %v1747_v43 }
 0x149   : > { %1285 = vpow2.f32 %v1121_v54 }
 0x151   : > { %v1280_v57 = vpop.eup %1279 }
 0x152   : > { %v397_v58 = vmul.f32 %v1280_v57, %v369_v24  ;;  %v417_v57 = vmul.f32 %v412_v44, %v403_v9 }
 0x153   : > { %v1282_v60 = vpop.eup %1281 }
 0x154   : > { %v398_v61 = vmul.f32 %v1282_v60, %v370_v29  ;;  %v1764_v62 = vmul.f32 %v583_v56, %v397_v58  ;;  %615 = vrot.lane.b32.xlu0 %v397_v58, %s1520_s21  ;;  %421 = vrot.lane.b32.xlu1 %v397_v58, %s1521_s23  ;;  %v1862_v56 = vrot.slane %v1754_v51, %v495_v39 }
 0x155   : > { %v1284_v0 = vpop.eup %1283  ;;  %v1871_v60 = vmul.f32 %v412_v44, %v1738_v23 }
 0x156   : > { %v1768_v63 = vmul.f32 %v584_v59, %v398_v61  ;;  %v1774_v1 = vmul.f32 %v1284_v0, %v371_v32  ;;  %v1286_v2 = vpop.eup %1285  ;;  %v1868_v59 = vrot.slane %v1754_v51, %v536_v42  ;;  %v605_v0 = vsub.s32 5, %v1747_v43 }
 0x157   : > { %v388_v3 = vadd.f32 1.0, %v1286_v2  ;;  %v1875_v2 = vand.u32 127, %v409_v36 }
 0x158   : > { %464 = vrot.lane.b32.xlu1 %v397_v58, %s1522_s10  ;;  %509 = vrot.lane.b32.xlu0 %v398_v61, %s1523_s12  ;;  %v543_v15 = vmul.f32 %v1868_v59, %v528_v12 }
 0x159   : > { %1287 = vrcp.f32 %v388_v3  ;;  %v1878_v3 = vmul.f32 %v416_v45, %v1738_v23  ;;  %vm431_vm1 = vcmp.lt.s32.totalorder %v1875_v2, 17  ;;  %vm513_vm2 = vcmp.lt.s32.totalorder %v1875_v2, 15 }
 0x15a   : > { %vm472_vm3 = vcmp.lt.s32.totalorder %v1875_v2, 16  ;;  %vm554_vm4 = vcmp.lt.s32.totalorder %v1875_v2, 1  ;;  %vm623_vm5 = vcmp.lt.s32.totalorder %v1875_v2, 127  ;;  %vm664_vm6 = vcmp.lt.s32.totalorder %v1875_v2, 113 }
 0x15b   : > { %vm705_vm7 = vcmp.lt.s32.totalorder %v1875_v2, 112  ;;  %vm746_vm8 = vcmp.lt.s32.totalorder %v1875_v2, 111 }
 0x15c   : > { %505 = vrot.lane.b32.xlu1 %v397_v58, %s1523_s12  ;;  %619 = vrot.lane.b32.xlu0 %v398_v61, %s1520_s21 }
 0x160   : > { %546 = vrot.lane.b32.xlu1 %v397_v58, %s1524_s13  ;;  %423 = vrot.lane.b32.xlu0 %v1774_v1, %s1521_s23 }
 0x164   : > { %656 = vrot.lane.b32.xlu1 %v397_v58, %s1525_s14  ;;  %466 = vrot.lane.b32.xlu0 %v1774_v1, %s1522_s10 }
 0x166   : > { %v1288_v4 = vpop.eup %1287 }
 0x167   : > { %v1786_v7 = vmul.f32 %v1288_v4, %v372_v50  ;;  %v1855_v50 = vrot.slane %v1752_v48, %v495_v39  ;;  %v1880_v4 = vmul.f32 %v455_v47, %v450_v10  ;;  %v460_v39 = vmul.f32 %v455_v47, %v1740_v33 }
 0x168   : > { %697 = vrot.lane.b32.xlu1 %v397_v58, %s1526_s28  ;;  %548 = vrot.lane.b32.xlu0 %v1774_v1, %s1524_s13  ;;  %v1898_v47 = vrot.slane %v1752_v48, %v605_v0 }
 0x169   : > { %v501_v23 = vmul.f32 %v1855_v50, %v1742_v35 }
 0x16a   : > { %2169 = vst [vmem:[#allocation24_spill] sm:$0xff] %v1898_v47 }
 0x16c   : > { %738 = vrot.lane.b32.xlu1 %v397_v58, %s1527_s29  ;;  %658 = vrot.lane.b32.xlu0 %v1774_v1, %s1525_s14  ;;  %v1865_v58 = vrot.slane %v1752_v48, %v536_v42  ;;  %v461_v42 = vmul.f32 %v459_v49, %v1740_v33  ;;  %v1901_v33 = vrot.slane %v1754_v51, %v605_v0 }
 0x16e   : > { %v612_v19 = vmul.f32 %v1901_v33, %v1816_v17 }
 0x170   : > { %425 = vrot.lane.b32.xlu1 %v398_v61, %s1521_s23  ;;  %699 = vrot.lane.b32.xlu0 %v1774_v1, %s1526_s28 }
 0x174   : > { %468 = vrot.lane.b32.xlu1 %v398_v61, %s1522_s10  ;;  %740 = vrot.lane.b32.xlu0 %v1774_v1, %s1527_s29 }
 0x178   : > { %550 = vrot.lane.b32.xlu1 %v398_v61, %s1524_s13  ;;  %427 = vrot.lane.b32.xlu0 %v1786_v7, %s1521_s23 }
 0x17c   : > { %660 = vrot.lane.b32.xlu1 %v398_v61, %s1525_s14  ;;  %470 = vrot.lane.b32.xlu0 %v1786_v7, %s1522_s10  ;;  %s1000_s10 = scalar_lea.hbm %s2128_s4, %s1138_s8 }
 0x180   : > { %701 = vrot.lane.b32.xlu1 %v398_v61, %s1526_s28  ;;  %552 = vrot.lane.b32.xlu0 %v1786_v7, %s1524_s13  ;;  %s1425_s13 = scalar_lea.vmem %s1003_s24, 256 }
 0x181   : > { %p1426_p4 = scmp.ne.s32.totalorder %s1003_s24, %s1425_s13 }
 0x183   : > { %p1427_p12 = pnand %p1426_p4, %p2183_p6 }
 0x184   : > { %742 = vrot.lane.b32.xlu1 %v398_v61, %s1527_s29  ;;  %662 = vrot.lane.b32.xlu0 %v1786_v7, %s1525_s14  ;;  %v418_v61 = vmul.f32 %v416_v45, %v403_v9  ;;  %v687_v9 = vsub.s32 7, %v1747_v43  ;;  %v542_v45 = vmul.f32 %v1865_v58, %v528_v12  ;;  %v1906_v43 = vrot.slane %v1752_v48, %v646_v37  ;;  %s1431_s14 = scalar_lea.vmem %s1430_s20, 512 }
 0x185   : > { %p1428_p0 = pneg %p1427_p12  ;;  %p1433_p3 = scmp.lt.s32.totalorder %s1431_s14, %s1425_s13 }
 0x186   : > { %v1916_v34 = vrot.slane %v1752_v48, %v687_v9  ;;  %v1919_v0 = vrot.slane %v1754_v51, %v687_v9 }
 0x187   : > { %p1434_p7 = por %p1433_p3, %p1432_p5 }
 0x188   : > { %507 = vrot.lane.b32.xlu1 %v1774_v1, %s1523_s12  ;;  %703 = vrot.lane.b32.xlu0 %v1786_v7, %s1526_s28 }
 0x189   : > { %p1435_p9 = pnand %p1434_p7, %p1428_p0 }
 0x18c   : > { %617 = vrot.lane.b32.xlu1 %v1774_v1, %s1520_s21  ;;  %744 = vrot.lane.b32.xlu0 %v1786_v7, %s1527_s29 }
 0x190   : > { %511 = vrot.lane.b32.xlu1 %v1786_v7, %s1523_s12  ;;  %764 = vperm.xlu0 %1266, %v1713_v6   ;;  %s988_s12 = scalar_lea.sflag [#allocation4], %s1686_s11 }
 0x194   : > { %760 = vperm.xlu1 %1265, %v1708_v5  }
 0x198   : > { %621 = vrot.lane.b32.xlu1 %v1786_v7, %s1520_s21 }
 0x199   : > { %1267 = vset.pattern.permute.xlu1 %v1528_v8  ;;  %v1882_v8 = vmul.f32 %v459_v49, %v450_v10  ;;  %v502_v10 = vmul.f32 %v1862_v56, %v1742_v35  ;;  %v1909_v49 = vrot.slane %v1754_v51, %v646_v37 }
 0x19b   : > { %v653_v18 = vmul.f32 %v1909_v49, %v1810_v13 }
 0x19c   : > { %772 = vperm.xlu1 %1267, %v1708_v5  }
 0x1a0   : > { %776 = vperm.xlu1 %1267, %v1713_v6   ;;  %v611_v6 = vmul.f32 %v1898_v47, %v1816_v17 }
 0x1c6   : > { %v1826_v22 = vpop.permute.xlu0 %615  ;;  %v422_v24 = vpop.permute.xlu1 %421 }
 0x1ca   : > { %v465_v25 = vpop.permute.xlu1 %464  ;;  %v510_v26 = vpop.permute.xlu0 %509 }
 0x1ce   : > { %v506_v27 = vpop.permute.xlu1 %505  ;;  %v1828_v28 = vpop.permute.xlu0 %619 }
 0x1cf   : > { %v514_v37 = vsel %vm513_vm2, %v506_v27, %v510_v26 }
 0x1d2   : > { %v1830_v29 = vpop.permute.xlu1 %546  ;;  %v1832_v30 = vpop.permute.xlu0 %423 }
 0x1d6   : > { %v1834_v31 = vpop.permute.xlu1 %656  ;;  %v1836_v32 = vpop.permute.xlu0 %466 }
 0x1da   : > { %v1843_v40 = vpop.permute.xlu1 %697  ;;  %v1845_v41 = vpop.permute.xlu0 %548 }
 0x1de   : > { %v1857_v53 = vpop.permute.xlu1 %738  ;;  %v1859_v54 = vpop.permute.xlu0 %658 }
 0x1df   : > { %2167 = vst [vmem:[#allocation22_spill] sm:$0xff] %v1859_v54 }
 0x1e2   : > { %v426_v44 = vpop.permute.xlu1 %425  ;;  %v1889_v36 = vpop.permute.xlu0 %699 }
 0x1e3   : > { %2168 = vst [vmem:[#allocation23_spill] sm:$0xff] %v1889_v36  ;;  %v432_v35 = vsel %vm431_vm1, %v422_v24, %v426_v44  ;;  %v434_v12 = vsel %vm431_vm1, %v426_v44, %v422_v24  ;;  %v516_v24 = vsel %vm513_vm2, %v510_v26, %v506_v27  ;;  %v519_v27 = vmul.f32 %v514_v37, %v502_v10 }
 0x1e4   : > { %v436_v9 = vmul.f32 %v434_v12, %v417_v57  ;;  %v437_v44 = vmul.f32 %v432_v35, %v418_v61  ;;  %v518_v26 = vmul.f32 %v516_v24, %v501_v23  ;;  %v693_v57 = vmul.f32 %v1916_v34, %v1814_v16 }
 0x1e5   : > { %v624_v23 = vsel %vm623_vm5, %v1826_v22, %v1828_v28  ;;  %v626_v10 = vsel %vm623_vm5, %v1828_v28, %v1826_v22 }
 0x1e6   : > { %v469_v5 = vpop.permute.xlu1 %468  ;;  %v1923_v36 = vpop.permute.xlu0 %740  ;;  %v628_v37 = vmul.f32 %v624_v23, %v611_v6  ;;  %v585_v23 = vmul.f32 %v1757_v52, %v1812_v14  ;;  %v544_v52 = vmul.f32 %v1865_v58, %v1749_v46 }
 0x1e7   : > { %2170 = vst [vmem:[#allocation25_spill] sm:$0xff] %v1923_v36  ;;  %v473_v48 = vsel %vm472_vm3, %v465_v25, %v469_v5  ;;  %v475_v51 = vsel %vm472_vm3, %v469_v5, %v465_v25  ;;  %v652_v36 = vmul.f32 %v1906_v43, %v1810_v13 }
 0x1e8   : > { %v477_v20 = vmul.f32 %v475_v51, %v460_v39  ;;  %v478_v54 = vmul.f32 %v473_v48, %v461_v42 }
 0x1ea   : > { %v481_v47 = vadd.f32 %v477_v20, %v436_v9  ;;  %v482_v11 = vadd.f32 %v478_v54, %v437_v44  ;;  %v551_v5 = vpop.permute.xlu1 %550  ;;  %v428_v25 = vpop.permute.xlu0 %427  ;;  %v694_v54 = vmul.f32 %v1919_v0, %v1814_v16 }
 0x1eb   : > { %v555_v61 = vsel %vm554_vm4, %v1830_v29, %v551_v5  ;;  %v557_v13 = vsel %vm554_vm4, %v551_v5, %v1830_v29 }
 0x1ec   : > { %v522_v17 = vadd.f32 %v518_v26, %v481_v47  ;;  %v523_v39 = vadd.f32 %v519_v27, %v482_v11  ;;  %v559_v42 = vmul.f32 %v557_v13, %v542_v45  ;;  %v560_v20 = vmul.f32 %v555_v61, %v543_v15 }
 0x1ed   : > { %v433_v15 = vsel %vm431_vm1, %v1832_v30, %v428_v25  ;;  %v435_v11 = vsel %vm431_vm1, %v428_v25, %v1832_v30  ;;  %v629_v30 = vmul.f32 %v626_v10, %v612_v19 }
 0x1ee   : > { %v563_v29 = vadd.f32 %v559_v42, %v522_v17  ;;  %v564_v47 = vadd.f32 %v560_v20, %v523_v39  ;;  %v661_v16 = vpop.permute.xlu1 %660  ;;  %v471_v45 = vpop.permute.xlu0 %470  ;;  %v438_v51 = vmul.f32 %v435_v11, %v1871_v60  ;;  %v439_v9 = vmul.f32 %v433_v15, %v1878_v3 }
 0x1ef   : > { %v665_v35 = vsel %vm664_vm6, %v1834_v31, %v661_v16  ;;  %v667_v22 = vsel %vm664_vm6, %v661_v16, %v1834_v31  ;;  %v474_v28 = vsel %vm472_vm3, %v1836_v32, %v471_v45  ;;  %v476_v12 = vsel %vm472_vm3, %v471_v45, %v1836_v32 }
 0x1f0   : > { %v591_v24 = vadd.f32 %v1764_v62, %v563_v29  ;;  %v592_v48 = vadd.f32 %v1768_v63, %v564_v47  ;;  %v479_v31 = vmul.f32 %v476_v12, %v1880_v4  ;;  %v480_v44 = vmul.f32 %v474_v28, %v1882_v8  ;;  %v1122_v12 = vld [vmem:[#allocation8 + $0x10] ss:$0 sm:$0xff] }
 0x1f1   : > { %v669_v5 = vmul.f32 %v665_v35, %v652_v36  ;;  %v670_v25 = vmul.f32 %v667_v22, %v653_v18  ;;  %v503_v42 = vmul.f32 %v1855_v50, %v1744_v38  ;;  %v504_v20 = vmul.f32 %v1862_v56, %v1744_v38 }
 0x1f2   : > { %v632_v26 = vadd.f32 %v628_v37, %v591_v24  ;;  %v633_v27 = vadd.f32 %v629_v30, %v592_v48  ;;  %v702_v61 = vpop.permute.xlu1 %701  ;;  %v483_v32 = vadd.f32 %v479_v31, %v438_v51  ;;  %v484_v6 = vadd.f32 %v480_v44, %v439_v9  ;;  %v553_v39 = vpop.permute.xlu0 %552  ;;  %v1123_v37 = vld [vmem:[#allocation8 + $0x18] ss:$0 sm:$0xff]  ;;  %v2171_v9 = vld [vmem:[#allocation17_spill] sm:$0xff]  ;;  %v2172_v31 = vld [vmem:[#allocation24_spill] sm:$0xff] }
 0x1f3   : > { %v706_v62 = vsel %vm705_vm7, %v1843_v40, %v702_v61  ;;  %v708_v63 = vsel %vm705_vm7, %v702_v61, %v1843_v40  ;;  %v586_v40 = vmul.f32 %v1760_v55, %v1812_v14  ;;  %v558_v10 = vsel %vm554_vm4, %v553_v39, %v1845_v41 }
 0x1f4   : > { %v673_v19 = vadd.f32 %v669_v5, %v632_v26  ;;  %v674_v60 = vadd.f32 %v670_v25, %v633_v27  ;;  %v710_v3 = vmul.f32 %v706_v62, %v693_v57  ;;  %v711_v4 = vmul.f32 %v708_v63, %v694_v54  ;;  %v2173_v27 = vld [vmem:[#allocation19_spill] sm:$0xff]  ;;  %v2174_v25 = vld [vmem:[#allocation18_spill] sm:$0xff] }
 0x1f5   : > { %v556_v54 = vsel %vm554_vm4, %v1845_v41, %v553_v39  ;;  %v545_v55 = vmul.f32 %v1868_v59, %v1749_v46  ;;  %v561_v29 = vmul.f32 %v558_v10, %v544_v52  ;;  %v589_v41 = vmul.f32 %v585_v23, %v1774_v1 }
 0x1f6   : > { %v714_v8 = vadd.f32 %v710_v3, %v673_v19  ;;  %v715_v13 = vadd.f32 %v711_v4, %v674_v60  ;;  %v743_v17 = vpop.permute.xlu1 %742  ;;  %v590_v16 = vmul.f32 %v586_v40, %v1786_v7  ;;  %v663_v22 = vpop.permute.xlu0 %662  ;;  %v734_v1 = vmul.f32 %v1122_v12, %v1824_v21  ;;  %v2176_v19 = vld [vmem:[#allocation20_spill] sm:$0xff] }
 0x1f7   : > { %v562_v47 = vmul.f32 %v556_v54, %v545_v55  ;;  %v747_v46 = vsel %vm746_vm8, %v1857_v53, %v743_v17  ;;  %v749_v59 = vsel %vm746_vm8, %v743_v17, %v1857_v53  ;;  %v735_v7 = vmul.f32 %v1123_v37, %v1824_v21  ;;  %v2178_v54 = vld [vmem:[#allocation25_spill] sm:$0xff] }
 0x1f8   : > { %v751_v48 = vmul.f32 %v747_v46, %v734_v1  ;;  %v613_v44 = vmul.f32 %v2172_v31, %v2171_v9  ;;  %v614_v26 = vmul.f32 %v1901_v33, %v2171_v9  ;;  %v654_v5 = vmul.f32 %v1906_v43, %v2173_v27 }
 0x1f9   : > { %v752_v51 = vmul.f32 %v749_v59, %v735_v7  ;;  %v655_v53 = vmul.f32 %v1909_v49, %v2173_v27  ;;  %v695_v61 = vmul.f32 %v1916_v34, %v2174_v25  ;;  %v696_v21 = vmul.f32 %v1919_v0, %v2174_v25 }
 0x1fa   : > { %v508_v36 = vpop.permute.xlu1 %507  ;;  %v704_v30 = vpop.permute.xlu0 %703  ;;  %v755_v63 = vadd.f32 %v751_v48, %v714_v8  ;;  %v736_v60 = vmul.f32 %v1122_v12, %v2176_v19  ;;  %v737_v0 = vmul.f32 %v1123_v37, %v2176_v19 }
 0x1fb   : > { %v756_v43 = vadd.f32 %v752_v51, %v715_v13 }
 0x1fe   : > { %v618_v18 = vpop.permute.xlu1 %617  ;;  %v745_v3 = vpop.permute.xlu0 %744 }
 0x1ff   : > { %v748_v10 = vsel %vm746_vm8, %v2178_v54, %v745_v3 }
 0x202   : > { %v512_v57 = vpop.permute.xlu1 %511 }
 0x203   : > { %v515_v50 = vsel %vm513_vm2, %v508_v36, %v512_v57  ;;  %v517_v38 = vsel %vm513_vm2, %v512_v57, %v508_v36  ;;  %v2177_v36 = vld [vmem:[#allocation23_spill] sm:$0xff] }
 0x204   : > { %v520_v14 = vmul.f32 %v517_v38, %v503_v42  ;;  %v521_v56 = vmul.f32 %v515_v50, %v504_v20  ;;  %v707_v39 = vsel %vm705_vm7, %v2177_v36, %v704_v30  ;;  %v709_v8 = vsel %vm705_vm7, %v704_v30, %v2177_v36 }
 0x205   : > { %v750_v50 = vsel %vm746_vm8, %v745_v3, %v2178_v54  ;;  %v712_v55 = vmul.f32 %v707_v39, %v695_v61 }
 0x206   : > { %v524_v15 = vadd.f32 %v520_v14, %v483_v32  ;;  %v525_v11 = vadd.f32 %v521_v56, %v484_v6  ;;  %v2175_v32 = vld [vmem:[#allocation22_spill] sm:$0xff]  ;;  %v713_v14 = vmul.f32 %v709_v8, %v696_v21 }
 0x207   : > { %v666_v6 = vsel %vm664_vm6, %v2175_v32, %v663_v22  ;;  %v668_v33 = vsel %vm664_vm6, %v663_v22, %v2175_v32 }
 0x208   : > { %v565_v45 = vadd.f32 %v561_v29, %v524_v15  ;;  %v566_v35 = vadd.f32 %v562_v47, %v525_v11  ;;  %v671_v20 = vmul.f32 %v666_v6, %v654_v5  ;;  %v672_v23 = vmul.f32 %v668_v33, %v655_v53 }
 0x209   : > { %v753_v11 = vmul.f32 %v748_v10, %v736_v60  ;;  %v2180_v60 = vld [vmem:[#allocation16_spill] sm:$0xff] }
 0x20a   : > { %v593_v28 = vadd.f32 %v589_v41, %v565_v45  ;;  %v594_v58 = vadd.f32 %v590_v16, %v566_v35  ;;  %v754_v41 = vmul.f32 %v750_v50, %v737_v0 }
 0x20b   : > { %v765_v35 = vpop.permute.xlu0 %764 }
 0x20f   : > { %v761_v24 = vpop.permute.xlu1 %760 }
 0x210   : > { %v767_v13 = vmul.f32 %v761_v24, %v755_v63  ;;  %v768_v42 = vmul.f32 %v761_v24, %v756_v43 }
 0x213   : > { %v622_v62 = vpop.permute.xlu1 %621 }
 0x214   : > { %v625_v49 = vsel %vm623_vm5, %v618_v18, %v622_v62  ;;  %v627_v34 = vsel %vm623_vm5, %v622_v62, %v618_v18  ;;  %v2179_v62 = vld [vmem:[#allocation15_spill] sm:$0xff] }
 0x215   : > { %v630_v4 = vmul.f32 %v625_v49, %v613_v44  ;;  %v631_v17 = vmul.f32 %v627_v34, %v614_v26 }
 0x217   : > { %v634_v18 = vadd.f32 %v630_v4, %v593_v28  ;;  %v635_v40 = vadd.f32 %v631_v17, %v594_v58  ;;  %v773_v57 = vpop.permute.xlu1 %772 }
 0x218   : > { %v779_v38 = vadd.f32 %v773_v57, %v767_v13  ;;  %v780_v52 = vadd.f32 %v773_v57, %v768_v42 }
 0x219   : > { %v675_v56 = vadd.f32 %v671_v20, %v634_v18  ;;  %v676_v29 = vadd.f32 %v672_v23, %v635_v40 }
 0x21a   : > { %v1124_v47 = vmul.f32 -1.442695, %v779_v38  ;;  %v1125_v15 = vmul.f32 -1.442695, %v780_v52 }
 0x21b   : > { %v716_v16 = vadd.f32 %v712_v55, %v675_v56  ;;  %v717_v45 = vadd.f32 %v713_v14, %v676_v29  ;;  %v777_v12 = vpop.permute.xlu1 %776 }
 0x21c   : > { %1289 = vpow2.f32 %v1124_v47 }
 0x21d   : > { %1291 = vpow2.f32 %v1125_v15  ;;  %v757_v22 = vadd.f32 %v753_v11, %v716_v16  ;;  %v758_v28 = vadd.f32 %v754_v41, %v717_v45  ;;  %v1532_v41 = vmov 25  }
 0x21e   : > { %1269 = vset.pattern.permute.xlu1 %v1532_v41  ;;  %1268 = vset.pattern.permute.xlu0 %v1532_v41 }
 0x21f   : > { %v769_v58 = vmul.f32 %v765_v35, %v757_v22  ;;  %v770_v2 = vmul.f32 %v765_v35, %v758_v28 }
 0x221   : > { %v781_v37 = vadd.f32 %v777_v12, %v769_v58  ;;  %v782_v46 = vadd.f32 %v777_v12, %v770_v2 }
 0x223   : > { %v1126_v59 = vmul.f32 -1.442695, %v781_v37  ;;  %v1127_v1 = vmul.f32 -1.442695, %v782_v46 }
 0x225   : > { %1293 = vpow2.f32 %v1126_v59 }
 0x226   : > { %1295 = vpow2.f32 %v1127_v1 }
 0x229   : > { %v1290_v7 = vpop.eup %1289 }
 0x22a   : > { %v1292_v30 = vpop.eup %1291  ;;  %v795_v24 = vadd.f32 1.0, %v1290_v7  ;;  %v1533_v7 = vmov 17  }
 0x22b   : > { %v796_v48 = vadd.f32 1.0, %v1292_v30  ;;  %v260_v30 = vld [vmem:[#allocation7] sm:$0xff] }
 0x22c   : > { %1297 = vrcp.f32 %v795_v24  ;;  %v2182_v24 = vmov 16  }
 0x22d   : > { %1299 = vrcp.f32 %v796_v48 }
 0x232   : > { %v1294_v51 = vpop.eup %1293 }
 0x233   : > { %v1296_v9 = vpop.eup %1295  ;;  %v797_v31 = vadd.f32 1.0, %v1294_v51 }
 0x234   : > { %v798_v44 = vadd.f32 1.0, %v1296_v9 }
 0x235   : > { %1301 = vrcp.f32 %v797_v31 }
 0x236   : > { %1303 = vrcp.f32 %v798_v44 }
 0x239   : > { %v1298_v26 = vpop.eup %1297 }
 0x23a   : > { %v1300_v27 = vpop.eup %1299  ;;  %v2060_v5 = vmul.f32 %v1298_v26, %v779_v38  ;;  %v2181_v38 = vld [vmem:[#allocation21_spill] sm:$0xff] }
 0x23b   : > { %v2062_v53 = vmul.f32 %v1300_v27, %v780_v52 }
 0x23d   : > { %v811_v25 = vadd.f32 %v2062_v53, %v2060_v5 }
 0x23f   : > { %812 = vadd.xlane.f32.xlu0 %v811_v25 }
 0x242   : > { %v1302_v61 = vpop.eup %1301 }
 0x243   : > { %v1304_v21 = vpop.eup %1303  ;;  %v2066_v32 = vmul.f32 %v1302_v61, %v781_v37 }
 0x244   : > { %v2068_v6 = vmul.f32 %v1304_v21, %v782_v46 }
 0x246   : > { %v814_v33 = vadd.f32 %v2068_v6, %v2066_v32 }
 0x248   : > { %815 = vadd.xlane.f32.xlu1 %v814_v33 }
 0x255   : > { %832 = vrot.lane.b32.xlu0 %v2179_v62, %s1529_s7 }
 0x2c8   : > { %v813_v63 = vpop.xlane.xlu0 %812 }
 0x2c9   : > { %v818_v43 = vmul.f32 0.00390625, %v813_v63  ;;  %v1318_v63 = vld [vmem:[%s1692_s25 + $0x8] sm:$0xff] }
 0x2cb   : > { %v820_v34 = vmul.f32 %v818_v43, %v2179_v62 }
 0x2cc   : > { %v833_v20 = vpop.permute.xlu0 %832 }
 0x2cd   : > { %v823_v3 = vsel %vm822_vm9, %v820_v34, 0.0 }
 0x2d1   : > { %v816_v49 = vpop.xlane.xlu1 %815 }
 0x2d2   : > { %v819_v19 = vmul.f32 0.00390625, %v816_v49 }
 0x2d4   : > { %v821_v0 = vmul.f32 %v819_v19, %v2180_v60 }
 0x2d6   : > { %v824_v4 = vsel %vm822_vm9, %v821_v0, 0.0 }
 0x2d7   : > { %v825_v17 = vadd.f32 %v824_v4, %v823_v3 }
 0x2d9   : > { %v826_v36 = vrot.slane %v825_v17, 4 }
 0x2db   : > { %v827_v39 = vadd.f32 %v826_v36, %v825_v17 }
 0x2dd   : > { %v828_v8 = vrot.slane %v827_v39, 2 }
 0x2df   : > { %v829_v13 = vadd.f32 %v828_v8, %v827_v39 }
 0x2e1   : > { %v830_v42 = vrot.slane %v829_v13, 1 }
 0x2e3   : > { %v831_v23 = vadd.f32 %v830_v42, %v829_v13 }
 0x2e5   : > { %v835_v18 = vadd.f32 %v833_v20, %v831_v23 }
 0x2e7   : > { %v1128_v40 = vmul.f32 -1.442695, %v835_v18 }
 0x2e9   : > { %1305 = vpow2.f32 %v1128_v40 }
 0x2f6   : > { %v1306_v57 = vpop.eup %1305 }
 0x2f7   : > { %v839_v54 = vadd.f32 1.0, %v1306_v57 }
 0x2f9   : > { %1307 = vrcp.f32 %v839_v54 }
 0x306   : > { %v1308_v10 = vpop.eup %1307 }
 0x307   : > { %v842_v50 = vmul.f32 %v1308_v10, %v835_v18 }
 0x309   : > { %v846_v52 = vrot.slane %v842_v50, %v2181_v38 }
 0x30b   : > { %848 = vrot.lane.b32.xlu1 %v846_v52, %s1530_s30 }
 0x37d   : > { %v849_v55 = vpop.permute.xlu1 %848 }
 0x37e   : > { %v851_v14 = vmul.f32 %v849_v55, %v2179_v62  ;;  %v852_v56 = vmul.f32 %v849_v55, %v2180_v60 }
 0x380   : > { %857 = vrot.lane.b32.xlu0 %v852_v56, %s1531_s26  ;;  %855 = vrot.lane.b32.xlu1 %v851_v14, %s1531_s26 }
 0x3f2   : > { %v858_v29 = vpop.permute.xlu0 %857  ;;  %v856_v47 = vpop.permute.xlu1 %855 }
 0x3f3   : > { %v865_v15 = vsel %vm861_vm10, %v858_v29, 0.0  ;;  %v862_v11 = vsel %vm861_vm10, %v856_v47, 0.0 }
 0x3f4   : > { %866 = vadd.xlane.f32.xlu0 %v865_v15  ;;  %863 = vadd.xlane.f32.xlu1 %v862_v11 }
 0x47d   : > { %v867_v16 = vpop.xlane.xlu0 %866  ;;  %v864_v45 = vpop.xlane.xlu1 %863 }
 0x47e   : > { %v869_v35 = vadd.f32 %v867_v16, %v2180_v60  ;;  %v868_v22 = vadd.f32 %v864_v45, %v2179_v62 }
 0x480   : > { %v1130_v28 = vmul.f32 -1.442695, %v869_v35  ;;  %v1129_v58 = vmul.f32 -1.442695, %v868_v22 }
 0x482   : > { %1309 = vpow2.f32 %v1130_v28 }
 0x483   : > { %1311 = vpow2.f32 %v1129_v58 }
 0x48f   : > { %v1310_v2 = vpop.eup %1309 }
 0x490   : > { %v1312_v12 = vpop.eup %1311  ;;  %v877_v37 = vadd.f32 1.0, %v1310_v2 }
 0x491   : > { %v876_v46 = vadd.f32 1.0, %v1312_v12 }
 0x492   : > { %1313 = vrcp.f32 %v877_v37 }
 0x493   : > { %1315 = vrcp.f32 %v876_v46 }
 0x49f   : > { %v1314_v59 = vpop.eup %1313 }
 0x4a0   : > { %v1316_v1 = vpop.eup %1315  ;;  %889 = vperm.xlu0 %1268, %v1314_v59  }
 0x4a1   : > { %884 = vperm.xlu1 %1269, %v1316_v1  }
 0x4a4   : > { %1272 = vset.pattern.permute.xlu0 %v1533_v7 }
 0x4a5   : > { %1270 = vset.pattern.permute.xlu1 %v2182_v24 }
 0x4a6   : > { %972 = vperm.xlu1 %1270, %v260_v30  }
 0x4aa   : > { %1271 = vset.pattern.permute.xlu1 %v1533_v7 }
 0x4ab   : > { %978 = vperm.xlu1 %1271, %v260_v30  }
 0x51b   : > { %v890_v48 = vpop.permute.xlu0 %889 }
 0x51c   : > { %v894_v51 = vmul.f32 %v890_v48, %v2066_v32  ;;  %v885_v9 = vpop.permute.xlu1 %884  ;;  %v895_v31 = vmul.f32 %v890_v48, %v2068_v6 }
 0x51d   : > { %v893_v44 = vmul.f32 %v885_v9, %v2062_v53  ;;  %v892_v26 = vmul.f32 %v885_v9, %v2060_v5  ;;  %v1317_v53 = vld [vmem:[%s1692_s25] sm:$0xff] }
 0x51e   : > { %928 = vmatprep.subr.mxu1 %v895_v31 }
 0x51f   : > { %929 = vmatpush1.msra.mxu1 %v894_v51 }
 0x520   : > { %930 = vmatprep.subr.mxu1 %v893_v44 }
 0x521   : > { %931 = vmatpush1.msra.mxu1 %v892_v26  ;;  %v973_v27 = vpop.permute.xlu1 %972 }
 0x522   : > { %1131 = vmatmul.mubr.msk.f32.vlgmr.msra.gmra.mxu1 %vm896_vm11, %v260_v30 }
 0x526   : > { %v979_v61 = vpop.permute.xlu1 %978 }
 0x5e2   : > { %v966_v25 = vpop.f32.mrf.mxu1 }
 0x5e3   : > { %v975_v21 = vmul.f32 %v973_v27, %v966_v25 }
 0x5e4   : > { %v968_v32 = vpop.f32.mrf.mxu1 }
 0x5e5   : > { %v976_v6 = vmul.f32 %v973_v27, %v968_v32  ;;  %v981_v33 = vadd.f32 %v979_v61, %v975_v21 }
 0x5e7   : > { %v982_v5 = vadd.f32 %v979_v61, %v976_v6  ;;  %v983_v62 = vadd.f32 %v1317_v53, %v981_v33 }
 0x5e9   : > { %v984_v43 = vadd.f32 %v1318_v63, %v982_v5  ;;  %985 = vst [vmem:[%s255_s9] sm:$0xff] %v983_v62 }
 0x5eb   : > { %986 = vst [vmem:[%s255_s9 + $0x8] sm:$0xff] %v984_v43 }
 0x5ec   : > { %1438 = shalt.err (!%p1435_p9)
}
 0x5ed   : > { %s1439_s25 = scalar_lea.hbm %s1000_s10, 256  ;;  %s1443_s29 = scalar_lea.hbm %s2128_s4, 512 }
 0x5ee   : > { %p1440_p13 = scmp.ne.s32.totalorder %s1000_s10, %s1439_s25  ;;  %p1444_p11 = scmp.lt.s32.totalorder %s1000_s10, %s2128_s4 }
 0x5ef   : > { %p1445_p1 = scmp.lt.s32.totalorder %s1443_s29, %s1439_s25 }
 0x5f0   : > { %p1441_p8 = pnand %p1440_p13, %p2183_p6 }
 0x5f1   : > { %p1446_p2 = por %p1445_p1, %p1444_p11 }
 0x5f2   : > { %p1442_p10 = pneg %p1441_p8 }
 0x5f4   : > { %p1447_p4 = pnand %p1446_p2, %p1442_p10 }
 0x5f6   : > { %1450 = shalt.err (!%p1447_p4)
}
 0x5f7   : > { %1153 = dma.vmem_to_hbm [thread:$0]  (%p2183_p6), %s1003_s24, 256, %s1000_s10, %s988_s12  }
 0x5f8 PF: > { %s1014_s26 = sand.u32 1, %s1485_s15   ;;  %p2184_p12 = scmp.ne.s32.totalorder %s2148_s22, 0 }
 0x5f9   : > { %p2185_p0 = scmp.ge.s32.totalorder %s1497_s18, 2  ;;  %s1015_s8 = scalar_lea.sflag [#allocation4], %s1014_s26 }
 0x5fb   : > { %p1170_p5 = pnand %p2185_p0, %p2184_p12 }
 0x5fd   : > { %p1171_p3 = pneg %p1170_p5 }
 0x5ff   : > { %1480 = dma.done.wait (%p1171_p3), %s1015_s8, 256  }
 0x600   : > { %1482 = vsyncadd (%p1171_p3), %s1015_s8, 4294967040  ;;  %p19_p7 = scmp.ge.s32.totalorder %s1640_s27, 4   ;;  %s2186_s15 = smov %s1489_s16 }
 0x601   : > { %s2187_s16 = smov %s1493_s17  ;;  %s2188_s17 = smov %s1650_s5 }
 0x602   : > { %s2189_s18 = smov %s1640_s27  ;;  %21 = sbr.rel (!%p19_p7) target bundleno = 7 (0x7), region = 93 }
 0x607   :  { %1020 = vsyncpa [#allocation3], 1 }
 0x608   :  { %1022 = vsyncpa [#allocation3 + $0x1], 1 }
 0x609   :  { %1023 = vsyncpa [#allocation6], 1 }
 0x60a   :  { %1024 = vsyncpa [#allocation9], 1 }
 0x60b   :  { %1025 = vsyncpa [#allocation4], 1 }
 0x60c   :  { %1027 = vsyncpa [#allocation4 + $0x1], 1 }

</bundles_post_ra>
